<compile_context>
chip_gen: v5e
topology: v5e:2x2
jax: 0.10.0
libtpu: 0.0.40
codegen_flags: <defaults>
</compile_context>

<pallas_src>
import math

import jax
import jax.numpy as jnp
from jax.experimental import pallas as pl
from jax.experimental.pallas import tpu as pltpu

_LANE = 128
_MiB = 1024 * 1024


def _bias_add_kernel(x_ref, b_ref, o_ref):
    # (tm, TW) + (1, TW) row-broadcast add; VPU only, memory bound.
    o_ref[...] = x_ref[...] + b_ref[...]


def _sublane_multiple(itemsize: int) -> int:
    # f32 -> 8, bf16/f16 -> 16, int8/fp8 -> 32
    return {4: 8, 2: 16, 1: 32}.get(itemsize, 8)


def _vmem_limit_bytes() -> int:
    """Scoped-VMEM limit per chip generation.

    v7x has 64 MiB per TensorCore -> use half (32 MiB scoped).  v5e/v6e have
    128 MiB; this kernel has no scratch and trivial vreg pressure, so allow
    ~96 MiB and keep ~32 MiB headroom.
    """
    try:
        phys = int(getattr(pltpu.get_tpu_info(), "vmem_capacity_bytes", 128 * _MiB))
    except Exception:
        phys = 128 * _MiB
    if phys <= 64 * _MiB:
        return phys // 2
    return min(phys - 32 * _MiB, 96 * _MiB)


def _round_down(v: int, m: int) -> int:
    return (v // m) * m


def _pick_lane_tile(W: int, max_cols: int) -> int:
    """Largest multiple of 128 that divides W and is <= max_cols (>= 128)."""
    n = W // _LANE
    best = 1
    for d in range(1, min(n, max(1, max_cols // _LANE)) + 1):
        if n % d == 0:
            best = d
    return best * _LANE


def bias_linear(x, bias, *, tile_rows=None, donate_x=False,
                min_bytes_for_pallas=1 << 20):
    """Forward of Bias_linear: x + bias, bias broadcast over the last dim."""
    H = bias.shape[0]
    assert x.shape[-1] == H, "last dim of x must match bias"
    orig_shape = x.shape

    itemsize = jnp.dtype(x.dtype).itemsize
    total = int(x.size)
    b = bias.astype(x.dtype)

    # Tiny inputs: Pallas launch/DMA-setup overhead dominates; let XLA fuse it.
    if total * itemsize < min_bytes_for_pallas:
        return x + b

    sublane = _sublane_multiple(itemsize)
    vmem_limit = _vmem_limit_bytes()
    budget = int(vmem_limit * 0.85)  # usable fraction for the 4 stream buffers
    # 2x double-buffered input blocks + 2x double-buffered output blocks; the
    # bias block is kept small (guarded below) so it is roughly free.
    per_block = min(8 * _MiB, max(budget // 4, sublane * _LANE * itemsize))

    # ---- Working width W: lane-dense (multiple of 128) whenever possible ----
    if H % _LANE == 0:
        W = H
        b2 = b.reshape(1, W)
    else:
        lcm = (H * _LANE) // math.gcd(H, _LANE)
        # Guard the repack: only when the flattened slab divides evenly AND the
        # minimum double-buffered tile set (sublane rows x 4 buffers) fits the
        # VMEM budget -- avoids the lcm blowup for odd H (e.g. H=4097).
        if total % lcm == 0 and 4 * sublane * lcm * itemsize <= budget:
            W = lcm
            b2 = jnp.tile(b, W // H).reshape(1, W)
        else:
            W = H
            b2 = b.reshape(1, W)
            if 4 * sublane * W * itemsize > budget:
                # Huge, non-128-multiple hidden: the lane dim cannot be tiled
                # without padding; correctness first -> let XLA handle it.
                return x + b

    x2 = x.reshape(-1, W)
    M = x2.shape[0]

    # ---- Lane tile: keep stores lane-dense and blocks within the budget ----
    if W % _LANE == 0 and sublane * W * itemsize > per_block:
        TW = _pick_lane_tile(W, per_block // (sublane * itemsize))
    else:
        TW = W
    grid_w = pl.cdiv(W, TW)

    # ---- Row tile: byte-targeted (~4-8 MiB per x block), no row-count cap ----
    if tile_rows is None:
        tm = per_block // (TW * itemsize)
        tm = max(sublane, _round_down(tm, sublane))
    else:
        tm = max(sublane, _round_down(int(tile_rows), sublane))
    if tm >= M:
        tm = M
        # Never emit a single row step when the rows can be split: a multi-step
        # 'parallel' row axis lets both of v7x's TensorCores run (no-op v5e/v6e).
        if M >= 2 * sublane:
            tm = max(sublane, _round_down(M // 2, sublane))
    grid_m = pl.cdiv(M, tm)
    grid = (grid_m, grid_w)

    def run(single_buffer_bias: bool):
        bias_kwargs = {}
        if single_buffer_bias:
            # Constant bias block index -> one buffer suffices; saves VMEM
            # under v7x's 32 MiB scoped limit.
            bias_kwargs["pipeline_mode"] = pl.Buffered(1)
        return pl.pallas_call(
            _bias_add_kernel,
            out_shape=jax.ShapeDtypeStruct((M, W), x.dtype),
            grid_spec=pltpu.PrefetchScalarGridSpec(
                num_scalar_prefetch=0,
                grid=grid,
                in_specs=[
                    pl.BlockSpec((tm, TW), lambda i, j: (i, j)),
                    pl.BlockSpec((1, TW), lambda i, j: (0, j), **bias_kwargs),
                ],
                out_specs=pl.BlockSpec((tm, TW), lambda i, j: (i, j)),
            ),
            compiler_params=pltpu.CompilerParams(
                dimension_semantics=("parallel", "arbitrary"),
                vmem_limit_bytes=vmem_limit,
            ),
            input_output_aliases=({0: 0} if donate_x else {}),
        )(x2, b2)

    if grid_w == 1:
        # Bias block never changes across the grid -> try single-buffering it;
        # fall back to default double buffering if this JAX build rejects
        # pipeline_mode / Buffered(1) so the kernel always runs.
        try:
            out = run(True)
        except Exception:
            out = run(False)
    else:
        out = run(False)

    return out.reshape(orig_shape)


if __name__ == "__main__":
    key = jax.random.PRNGKey(0)
    kx, kb, kx2, kb2, kx3, kb3, kx4, kb4 = jax.random.split(key, 8)

    # 1) Shape implied by the module (hidden-last bias add); force Pallas.
    batch, seq, hidden = 2, 8, 32
    x = jax.random.normal(kx, (batch, seq, hidden), dtype=jnp.float32)
    bias = jax.random.normal(kb, (hidden,), dtype=jnp.float32)
    y = bias_linear(x, bias, min_bytes_for_pallas=0)
    jax.block_until_ready(y)
    assert y.shape == x.shape and y.dtype == x.dtype
    assert jnp.allclose(y, x + bias, atol=1e-6, rtol=1e-6)

    # 2) Lane-dense H with an explicit multi-step pipelined row grid.
    xb = jax.random.normal(kx2, (4, 256, 256), dtype=jnp.float32)
    bb = jax.random.normal(kb2, (256,), dtype=jnp.float32)
    yb = bias_linear(xb, bb, tile_rows=128, min_bytes_for_pallas=0)
    jax.block_until_ready(yb)
    assert jnp.allclose(yb, xb + bb, atol=1e-6, rtol=1e-6)

    # 3) Auto tile sizing: rows get split into >= 2 steps (megacore-friendly).
    xc = jax.random.normal(kx3, (4, 64, 384), dtype=jnp.float32)
    bc = jax.random.normal(kb3, (384,), dtype=jnp.float32)
    yc = bias_linear(xc, bc, min_bytes_for_pallas=0)
    jax.block_until_ready(yc)
    assert jnp.allclose(yc, xc + bc, atol=1e-6, rtol=1e-6)

    # 4) Fallback path: H not a multiple of 128 and element count not divisible
    #    by lcm(H, 128) -> full-width (masked-store) blocks, still correct.
    xd = jax.random.normal(kx4, (3, 5, 48), dtype=jnp.float32)
    bd = jax.random.normal(kb4, (48,), dtype=jnp.float32)
    yd = bias_linear(xd, bd, min_bytes_for_pallas=0)
    jax.block_until_ready(yd)
    assert jnp.allclose(yd, xd + bd, atol=1e-6, rtol=1e-6)

    print("KERNEL_OK")
</pallas_src>

<mosaic_0001>
module attributes {stable_mosaic.version = 11 : i64} {
  func.func @_bias_add_kernel(%arg0: i32, %arg1: i32, %arg2: memref<4x128xf32, #tpu.memory_space<vmem>>, %arg3: memref<1x128xf32, #tpu.memory_space<vmem>>, %arg4: memref<4x128xf32, #tpu.memory_space<vmem>>) attributes {dimension_semantics = [#tpu.dimension_semantics<parallel>, #tpu.dimension_semantics<arbitrary>], iteration_bounds = array<i64: 1, 1>, scalar_prefetch = 0 : i64, scratch_operands = 0 : i64, tpu.core_type = #tpu.core_type<tc>, window_params = [{transform_indices = @transform_0, window_bounds = array<i64: 4, 128>}, {pipeline_mode = #tpu.pipeline_mode<synchronous>, transform_indices = @transform_1, window_bounds = array<i64: 1, 128>}, {transform_indices = @transform_2, window_bounds = array<i64: 4, 128>}]} {
    %c0 = arith.constant 0 : index
    %c0_0 = arith.constant 0 : index
    %0 = vector.load %arg2[%c0, %c0_0] : memref<4x128xf32, #tpu.memory_space<vmem>>, vector<4x128xf32>
    %c0_1 = arith.constant 0 : index
    %c0_2 = arith.constant 0 : index
    %1 = vector.load %arg3[%c0_1, %c0_2] : memref<1x128xf32, #tpu.memory_space<vmem>>, vector<1x128xf32>
    %2 = vector.broadcast %1 : vector<1x128xf32> to vector<4x128xf32>
    %3 = arith.addf %0, %2 : vector<4x128xf32>
    %c0_3 = arith.constant 0 : index
    %c0_4 = arith.constant 0 : index
    %4 = vector.load %arg4[%c0_3, %c0_4] : memref<4x128xf32, #tpu.memory_space<vmem>>, vector<4x128xf32>
    tpu.vector_store %arg4[%c0_3, %c0_4], %3 {strides = array<i32>} : memref<4x128xf32, #tpu.memory_space<vmem>>, vector<4x128xf32>,
    return
  }
  func.func @transform_0(%arg0: i32, %arg1: i32) -> (i32, i32) {
    %c0_i32 = arith.constant 0 : i32
    return %arg0, %arg1 : i32, i32
  }
  func.func @transform_1(%arg0: i32, %arg1: i32) -> (i32, i32) {
    %c0_i32 = arith.constant 0 : i32
    %c0_i32_0 = arith.constant 0 : i32
    return %c0_i32, %arg1 : i32, i32
  }
  func.func @transform_2(%arg0: i32, %arg1: i32) -> (i32, i32) {
    %c0_i32 = arith.constant 0 : i32
    return %arg0, %arg1 : i32, i32
  }
}

module attributes {stable_mosaic.version = 11 : i64} {
  func.func @_bias_add_kernel(%arg0: i32, %arg1: i32, %arg2: memref<4x128xf32, #tpu.memory_space<vmem>>, %arg3: memref<1x128xf32, #tpu.memory_space<vmem>>, %arg4: memref<4x128xf32, #tpu.memory_space<vmem>>) attributes {dimension_semantics = [#tpu.dimension_semantics<parallel>, #tpu.dimension_semantics<arbitrary>], iteration_bounds = array<i64: 1, 1>, scalar_prefetch = 0 : i64, scratch_operands = 0 : i64, tpu.core_type = #tpu.core_type<tc>, window_params = [{transform_indices = @transform_0, window_bounds = array<i64: 4, 128>}, {transform_indices = @transform_1, window_bounds = array<i64: 1, 128>}, {transform_indices = @transform_2, window_bounds = array<i64: 4, 128>}]} {
    %c0 = arith.constant 0 : index
    %c0_0 = arith.constant 0 : index
    %0 = vector.load %arg2[%c0, %c0_0] : memref<4x128xf32, #tpu.memory_space<vmem>>, vector<4x128xf32>
    %c0_1 = arith.constant 0 : index
    %c0_2 = arith.constant 0 : index
    %1 = vector.load %arg3[%c0_1, %c0_2] : memref<1x128xf32, #tpu.memory_space<vmem>>, vector<1x128xf32>
    %2 = vector.broadcast %1 : vector<1x128xf32> to vector<4x128xf32>
    %3 = arith.addf %0, %2 : vector<4x128xf32>
    %c0_3 = arith.constant 0 : index
    %c0_4 = arith.constant 0 : index
    %4 = vector.load %arg4[%c0_3, %c0_4] : memref<4x128xf32, #tpu.memory_space<vmem>>, vector<4x128xf32>
    tpu.vector_store %arg4[%c0_3, %c0_4], %3 {strides = array<i32>} : memref<4x128xf32, #tpu.memory_space<vmem>>, vector<4x128xf32>,
    return
  }
  func.func @transform_0(%arg0: i32, %arg1: i32) -> (i32, i32) {
    %c0_i32 = arith.constant 0 : i32
    return %arg0, %arg1 : i32, i32
  }
  func.func @transform_1(%arg0: i32, %arg1: i32) -> (i32, i32) {
    %c0_i32 = arith.constant 0 : i32
    %c0_i32_0 = arith.constant 0 : i32
    return %c0_i32, %arg1 : i32, i32
  }
  func.func @transform_2(%arg0: i32, %arg1: i32) -> (i32, i32) {
    %c0_i32 = arith.constant 0 : i32
    return %arg0, %arg1 : i32, i32
  }
}

</mosaic_0001>

<bundles_post_ra>
// kernel: tpu_custom_call.1
= control target key start
LH: loop header
LB: loop body
LE: loop exit
PB: predicated region body
PF: predicated region fallthrough
CT: control target
= control target key end

     0   :  { %7 = vsyncpa [#allocation3], 0  ;;  %s174_s0 = inlined_call_operand.hbm [shape: f32[4,128], index: 0, kind: input, shape index: {}]   ;;  %s175_s1 = inlined_call_operand.hbm [shape: f32[1,128], index: 1, kind: input, shape index: {}]   ;;  %s176_s2 = inlined_call_operand.hbm [shape: f32[4,128], index: 2, kind: output, shape index: {}]  }
   0x1   :  { %8 = vsyncpa [#allocation6], 0 }
   0x2   :  { %9 = vsyncpa [#allocation4], 0  ;;  %s15_s11 = sshll.u32 %s174_s0, 4  ;;  %s147_s12 = smov [#allocation2]   ;;  %s16_s11 = int_to_ptr.hbm [resolvable:$true] %s15_s11 }
   0x3   :  { %s17_s13 = sshll.u32 %s147_s12, 4  ;;  %s26_s16 = sshll.u32 %s175_s1, 4  ;;  %s18_s13 = int_to_ptr.vmem [resolvable:$true] %s17_s13  ;;  %s27_s16 = int_to_ptr.hbm [resolvable:$true] %s26_s16 }
   0x4   :  { %20 = dma.hbm_to_vmem [thread:$0]  %s16_s11, 64, %s18_s13, [#allocation3]  }
   0x5   :  { %s148_s17 = smov [#allocation5]  }
   0x6   :  { %s28_s18 = sshll.u32 %s148_s17, 4  ;;  %s29_s18 = int_to_ptr.vmem [resolvable:$true] %s28_s18 }
   0x7   :  { %31 = dma.hbm_to_vmem [thread:$0]  %s27_s16, 16, %s29_s18, [#allocation6]  }
   0x8   :  { %141 = dma.done.wait [#allocation3], 64  }
   0x9   :  { %142 = vsyncadd [#allocation3], 4294967232 }
   0xa   :  { %143 = dma.done.wait [#allocation6], 16  }
   0xb   :  { %144 = vsyncadd [#allocation6], 4294967280  ;;  %s149_s19 = smov [#allocation7]   ;;  %s54_s22 = sshll.u32 %s176_s2, 4  ;;  %v40_v0 = vld [vmem:[#allocation2] sm:$0xf]  ;;  %s55_s22 = int_to_ptr.hbm [resolvable:$true] %s54_s22 }
   0xc   :  { %s52_s0 = sshll.u32 %s149_s19, 4  ;;  %v68_v1 = vld [vmem:[#allocation5] ss:$0 sm:$0xff]  ;;  %s53_s0 = int_to_ptr.vmem [resolvable:$true] %s52_s0 }
   0xd   :  { %v45_v2 = vadd.f32 %v68_v1, %v40_v0 }
   0xf   :  { %46 = vst [vmem:[#allocation7] sm:$0xf] %v45_v2 }
  0x10   :  { %57 = dma.vmem_to_hbm [thread:$0]  %s53_s0, 64, %s55_s22, [#allocation4]  }
  0x11   :  { %145 = dma.done.wait [#allocation4], 64  }
  0x12   :  { %146 = vsyncadd [#allocation4], 4294967232 }
  0x13   :  { %62 = vsyncpa [#allocation3], 1 }
  0x14   :  { %63 = vsyncpa [#allocation6], 1 }
  0x15   :  { %64 = vsyncpa [#allocation4], 1 }

// kernel: tpu_custom_call.1
= control target key start
LH: loop header
LB: loop body
LE: loop exit
PB: predicated region body
PF: predicated region fallthrough
CT: control target
= control target key end

     0   :  { %7 = vsyncpa [#allocation3], 0  ;;  %s174_s0 = inlined_call_operand.hbm [shape: f32[4,128], index: 0, kind: input, shape index: {}]   ;;  %s175_s1 = inlined_call_operand.hbm [shape: f32[1,128], index: 1, kind: input, shape index: {}]   ;;  %s176_s2 = inlined_call_operand.hbm [shape: f32[4,128], index: 2, kind: output, shape index: {}]  }
   0x1   :  { %8 = vsyncpa [#allocation6], 0 }
   0x2   :  { %9 = vsyncpa [#allocation4], 0  ;;  %s15_s11 = sshll.u32 %s174_s0, 4  ;;  %s147_s12 = smov [#allocation2]   ;;  %s16_s11 = int_to_ptr.hbm [resolvable:$true] %s15_s11 }
   0x3   :  { %s17_s13 = sshll.u32 %s147_s12, 4  ;;  %s26_s16 = sshll.u32 %s175_s1, 4  ;;  %s18_s13 = int_to_ptr.vmem [resolvable:$true] %s17_s13  ;;  %s27_s16 = int_to_ptr.hbm [resolvable:$true] %s26_s16 }
   0x4   :  { %20 = dma.hbm_to_vmem [thread:$0]  %s16_s11, 64, %s18_s13, [#allocation3]  }
   0x5   :  { %s148_s17 = smov [#allocation5]  }
   0x6   :  { %s28_s18 = sshll.u32 %s148_s17, 4  ;;  %s29_s18 = int_to_ptr.vmem [resolvable:$true] %s28_s18 }
   0x7   :  { %31 = dma.hbm_to_vmem [thread:$0]  %s27_s16, 16, %s29_s18, [#allocation6]  }
   0x8   :  { %141 = dma.done.wait [#allocation3], 64  }
   0x9   :  { %142 = vsyncadd [#allocation3], 4294967232 }
   0xa   :  { %143 = dma.done.wait [#allocation6], 16  }
   0xb   :  { %144 = vsyncadd [#allocation6], 4294967280  ;;  %s149_s19 = smov [#allocation7]   ;;  %s54_s22 = sshll.u32 %s176_s2, 4  ;;  %v40_v0 = vld [vmem:[#allocation2] sm:$0xf]  ;;  %s55_s22 = int_to_ptr.hbm [resolvable:$true] %s54_s22 }
   0xc   :  { %s52_s0 = sshll.u32 %s149_s19, 4  ;;  %v68_v1 = vld [vmem:[#allocation5] ss:$0 sm:$0xff]  ;;  %s53_s0 = int_to_ptr.vmem [resolvable:$true] %s52_s0 }
   0xd   :  { %v45_v2 = vadd.f32 %v68_v1, %v40_v0 }
   0xf   :  { %46 = vst [vmem:[#allocation7] sm:$0xf] %v45_v2 }
  0x10   :  { %57 = dma.vmem_to_hbm [thread:$0]  %s53_s0, 64, %s55_s22, [#allocation4]  }
  0x11   :  { %145 = dma.done.wait [#allocation4], 64  }
  0x12   :  { %146 = vsyncadd [#allocation4], 4294967232 }
  0x13   :  { %62 = vsyncpa [#allocation3], 1 }
  0x14   :  { %63 = vsyncpa [#allocation6], 1 }
  0x15   :  { %64 = vsyncpa [#allocation4], 1 }

</bundles_post_ra>
